<compile_context>
chip_gen: v7x
topology: tpu7x:2x2x1
jax: 0.10.0
libtpu: 0.0.40
codegen_flags: <defaults>
</compile_context>

<pallas_src>
import re

import jax
import jax.numpy as jnp
from jax.experimental import pallas as pl
from jax.experimental.pallas import tpu as pltpu


def _make_gcu_kernel(compute_dtype):
    def kernel(x_ref, o_ref):
        x = x_ref[...].astype(compute_dtype)
        # mul -> VPU, cos -> EUP (separate bundle slots); DMA stays the binding unit.
        o_ref[...] = (x * jnp.cos(x)).astype(o_ref.dtype)
    return kernel


_LANE_CANDIDATES = (8192, 4096, 2048, 1024, 512, 256, 128)  # widest lane-dense divisor
_SUBLANE_FOR_ITEMSIZE = {4: 8, 2: 16, 1: 32}                # (8,128) tiling packs sublanes
_MIN_BLOCKS = 8                                             # target grid size when possible


def _tpu_generation():
    """Best-effort TPU generation (5 for v5e, 6 for v6e, 7 for v7x, ...)."""
    try:
        kind = jax.devices()[0].device_kind
        m = re.search(r"v(\d+)", kind)
        return int(m.group(1)) if m else None
    except Exception:
        return None


def _vmem_limit_bytes():
    """Scoped-VMEM ask: physical capacity minus headroom, capped at 64 MiB."""
    try:
        phys = int(pltpu.get_tpu_info().vmem_capacity_bytes)
    except Exception:
        phys = 64 * 1024 * 1024  # conservative: v7x per-TC VMEM
    return min(max(phys - (16 << 20), 16 << 20), 64 << 20)


def _compute_dtype(dtype):
    """Native bf16 compute on v6e+/v7x; upcast sub-32-bit floats to f32 otherwise."""
    dt = jnp.dtype(dtype)
    if not jnp.issubdtype(dt, jnp.floating) or dt.itemsize >= 4:
        return dtype
    gen = _tpu_generation()
    if dt == jnp.dtype(jnp.bfloat16) and gen is not None and gen >= 6:
        return dtype
    return jnp.float32


def growing_cosine_unit(x, *, target_block_bytes=None):
    """Applies y = x * cos(x) elementwise via a tiled Pallas TPU kernel."""
    orig_shape = x.shape
    dtype = x.dtype
    n = x.size
    if n == 0:
        return x.reshape(orig_shape)
    itemsize = jnp.dtype(dtype).itemsize
    sublane = _SUBLANE_FOR_ITEMSIZE.get(itemsize, 8)

    flat = x.reshape(-1)

    # Widest lane count that divides n exactly -> zero-copy lane-dense reshape.
    lanes = next((c for c in _LANE_CANDIDATES if n % c == 0), None)
    pad = 0
    if lanes is None:
        # Rare ragged path (n not a multiple of 128): minimal tail pad (<=127 elems).
        # TODO(synk): replace with an in-kernel masked tail store to avoid the
        # extra pad/slice HBM passes for ragged sizes.
        lanes = 128
        pad = (-n) % lanes
        flat = jnp.pad(flat, (0, pad))
    rows = flat.size // lanes
    x2d = flat.reshape(rows, lanes)

    vmem_limit = _vmem_limit_bytes()
    if target_block_bytes is None:
        # 4 pipeline buffers (2 in + 2 out) plus slack must fit under vmem_limit.
        target_block_bytes = vmem_limit // 6

    # Largest legal row tile that keeps one block under target_block_bytes.
    max_tr = max(sublane,
                 (target_block_bytes // (lanes * itemsize)) // sublane * sublane)
    # Prefer >= _MIN_BLOCKS blocks: keeps double-buffering overlapped and lets
    # the "parallel" grid axis shard across both TensorCores on v7x megacore.
    want_tr = -(-rows // _MIN_BLOCKS)                       # ceil(rows / MIN_BLOCKS)
    want_tr = max(sublane, -(-want_tr // sublane) * sublane)  # round up to sublane
    tr = min(max_tr, want_tr)
    if tr >= rows:
        tr = rows  # single block; full-extent block dim is always layout-legal
    grid = (pl.cdiv(rows, tr),)

    kernel = _make_gcu_kernel(_compute_dtype(dtype))

    cost = pl.CostEstimate(
        flops=n,                         # the multiply
        transcendentals=n,               # cos on the EUP
        bytes_accessed=2 * n * itemsize,
    )

    out2d = pl.pallas_call(
        kernel,
        out_shape=jax.ShapeDtypeStruct((rows, lanes), dtype),
        grid_spec=pltpu.PrefetchScalarGridSpec(
            num_scalar_prefetch=0,
            grid=grid,
            in_specs=[pl.BlockSpec((tr, lanes), lambda i: (i, 0))],
            out_specs=pl.BlockSpec((tr, lanes), lambda i: (i, 0)),
        ),
        compiler_params=pltpu.CompilerParams(
            dimension_semantics=("parallel",),   # megacore sharding on v7x
            vmem_limit_bytes=vmem_limit,
        ),
        cost_estimate=cost,
    )(x2d)

    out = out2d.reshape(-1)
    if pad:
        out = out[:n]
    return out.reshape(orig_shape)


if __name__ == "__main__":
    key = jax.random.PRNGKey(0)

    # Primary case: shape from the module spec, size is a multiple of 128
    # (zero-copy lane-dense path).
    x = jax.random.normal(key, (2, 4, 16, 16), dtype=jnp.float32)
    y_ref = x * jnp.cos(x)
    y = jax.block_until_ready(growing_cosine_unit(x))
    assert y.shape == x.shape and y.dtype == x.dtype
    assert jnp.allclose(y, y_ref, atol=2e-5, rtol=2e-5)

    # Ragged-size fallback path (n % 128 != 0).
    x2 = jax.random.normal(jax.random.PRNGKey(1), (3, 5, 7), dtype=jnp.float32)
    y2 = jax.block_until_ready(growing_cosine_unit(x2))
    assert y2.shape == x2.shape and y2.dtype == x2.dtype
    assert jnp.allclose(y2, x2 * jnp.cos(x2), atol=2e-5, rtol=2e-5)

    # Ragged grid (rows % tr != 0) -> exercises the masked partial last block.
    x3 = jax.random.normal(jax.random.PRNGKey(2), (100, 128), dtype=jnp.float32)
    y3 = jax.block_until_ready(growing_cosine_unit(x3, target_block_bytes=16 * 1024))
    assert y3.shape == x3.shape and y3.dtype == x3.dtype
    assert jnp.allclose(y3, x3 * jnp.cos(x3), atol=2e-5, rtol=2e-5)

    print("KERNEL_OK")
</pallas_src>

<mosaic_0001>
module attributes {stable_mosaic.version = 11 : i64} {
  func.func @kernel(%arg0: i32, %arg1: memref<1x2048xf32, #tpu.memory_space<vmem>>, %arg2: memref<1x2048xf32, #tpu.memory_space<vmem>>) attributes {dimension_semantics = [#tpu.dimension_semantics<parallel>], iteration_bounds = array<i64: 1>, scalar_prefetch = 0 : i64, scratch_operands = 0 : i64, tpu.core_type = #tpu.core_type<tc>, window_params = [{transform_indices = @transform_0, window_bounds = array<i64: 1, 2048>}, {transform_indices = @transform_1, window_bounds = array<i64: 1, 2048>}]} {
    %c0 = arith.constant 0 : index
    %c0_0 = arith.constant 0 : index
    %0 = vector.load %arg1[%c0, %c0_0] : memref<1x2048xf32, #tpu.memory_space<vmem>>, vector<1x2048xf32>
    %1 = math.cos %0 : vector<1x2048xf32>
    %2 = arith.mulf %0, %1 : vector<1x2048xf32>
    %c0_1 = arith.constant 0 : index
    %c0_2 = arith.constant 0 : index
    %3 = vector.load %arg2[%c0_1, %c0_2] : memref<1x2048xf32, #tpu.memory_space<vmem>>, vector<1x2048xf32>
    tpu.vector_store %arg2[%c0_1, %c0_2], %2 {strides = array<i32>} : memref<1x2048xf32, #tpu.memory_space<vmem>>, vector<1x2048xf32>,
    return
  }
  func.func @transform_0(%arg0: i32) -> (i32, i32) {
    %c0_i32 = arith.constant 0 : i32
    %c0_i32_0 = arith.constant 0 : i32
    return %arg0, %c0_i32 : i32, i32
  }
  func.func @transform_1(%arg0: i32) -> (i32, i32) {
    %c0_i32 = arith.constant 0 : i32
    %c0_i32_0 = arith.constant 0 : i32
    return %arg0, %c0_i32 : i32, i32
  }
}

</mosaic_0001>

<bundles_post_ra>
// kernel: tpu_custom_call.1
= control target key start
LH: loop header
LB: loop body
LE: loop exit
PB: predicated region body
PF: predicated region fallthrough
CT: control target
= control target key end

     0   :  { %6 = vsyncpa [#allocation3], 0  ;;  %s458_s0 = inlined_call_operand.hbm [shape: f32[1,2048], index: 0, kind: input, shape index: {}]   ;;  %s459_s1 = inlined_call_operand.hbm [shape: f32[1,2048], index: 1, kind: output, shape index: {}]  }
   0x1   :  { %7 = vsyncpa [#allocation4], 0  ;;  %s328_s6 = smov [#allocation2]   ;;  %s280_s10 = scalar_lea.hbm %s458_s0, 256 }
   0x2   :  { %s14_s7 = sshll.u32 %s328_s6, 4  ;;  %p281_p0 = scmp.ne.s32.totalorder %s458_s0, %s280_s10  ;;  %s15_s7 = int_to_ptr.vmem [resolvable:$true] %s14_s7 }
   0x3   :  { %p284_p1 = scmp.lt.u32.totalorder %s280_s10, %s458_s0 }
   0x5   :  { %p286_p2 = pnand %p284_p1, %p281_p0 }
   0x7   :  { %289 = shalt.err (!%p286_p2)
}
   0x8   :  { %s290_s15 = scalar_lea.vmem %s15_s7, 256  ;;  %p295_p4 = scmp.lt.s32.totalorder %s15_s7, %s15_s7 }
   0x9   :  { %p291_p3 = scmp.ne.s32.totalorder %s15_s7, %s290_s15  ;;  %p296_p5 = scmp.lt.s32.totalorder %s290_s15, %s290_s15 }
   0xb   :  { %p297_p6 = por %p296_p5, %p295_p4 }
   0xd   :  { %p298_p7 = pnand %p297_p6, %p291_p3 }
   0xf   :  { %301 = shalt.err (!%p298_p7)
}
  0x10   :  { %17 = dma.hbm_to_vmem [thread:$0]  %s458_s0, 256, %s15_s7, [#allocation3]  }
  0x11   :  { %324 = dma.done.wait [#allocation3], 256  }
  0x12   :  { %325 = vsyncadd [#allocation3], 4294967040  ;;  %v358_v0 = vld [vmem:[#allocation2] sm:$0xff]  ;;  %v360_v1 = vld [vmem:[#allocation2 + $0x8] sm:$0xff]  ;;  %v329_v24 = vmov 683565275  }
  0x13   :  { %v23_v2 = vand.u32 2147483647, %v358_v0  ;;  %v26_v3 = vand.u32 2139095040, %v358_v0  ;;  %v126_v4 = vand.u32 2147483647, %v360_v1  ;;  %v129_v5 = vand.u32 2139095040, %v360_v1 }
  0x14   :  { %v330_v26 = vmov 2475754826   ;;  %v331_v28 = vmov 2131351028   ;;  %v332_v30 = vmov 2102212464  }
  0x15   :  { %v27_v6 = vshrl.u32 %v26_v3, 23  ;;  %v30_v7 = vand.u32 8388607, %v23_v2  ;;  %v130_v8 = vshrl.u32 %v129_v5, 23  ;;  %v133_v9 = vand.u32 8388607, %v126_v4 }
  0x16   :  { %v333_v32 = vmov 920167782   ;;  %v334_v40 = vmov 1326507024   ;;  %vm25_vm14 = vcmp.lt.s32.totalorder %v358_v0, 0  ;;  %s335_s0 = smov [#allocation5]  }
  0x17   :  { %v248_v10 = vadd.s32 4294967169, %v27_v6  ;;  %v252_v11 = vadd.s32 4294967169, %v130_v8  ;;  %v31_v13 = vor.u32 8388608, %v30_v7  ;;  %v134_v14 = vor.u32 8388608, %v133_v9  ;;  %s239_s18 = sshll.u32 %s335_s0, 4  ;;  %s240_s18 = int_to_ptr.vmem [resolvable:$true] %s239_s18 }
  0x18   :  { %vm421_vm15 = vcmp.le.f32.partialorder %v23_v2, 0.7853982  ;;  %s302_s19 = scalar_lea.vmem %s240_s18, 256  ;;  %p307_p9 = scmp.lt.s32.totalorder %s240_s18, %s240_s18 }
  0x19   :  { %v33_v12 = vadd.s32 1, %v248_v10  ;;  %v136_v15 = vadd.s32 1, %v252_v11  ;;  %v370_v20 = vshll.u32 %v31_v13, 8  ;;  %v372_v22 = vshll.u32 %v134_v14, 8  ;;  %p303_p8 = scmp.ne.s32.totalorder %s240_s18, %s302_s19  ;;  %p308_p10 = scmp.lt.s32.totalorder %s302_s19, %s302_s19 }
  0x1b   :  { %vm34_vm0 = vcmp.gt.s32.totalorder %v33_v12, 0  ;;  %vm137_vm1 = vcmp.gt.s32.totalorder %v136_v15, 0  ;;  %p309_p11 = por %p308_p10, %p307_p9 }
  0x1c   :  { %v35_v16 = vsel %vm34_vm0, %v33_v12, 0  ;;  %v138_v19 = vsel %vm137_vm1, %v136_v15, 0  ;;  %vm128_vm0 = vcmp.lt.s32.totalorder %v360_v1, 0  ;;  %vm433_vm1 = vcmp.le.f32.partialorder %v126_v4, 0.7853982 }
  0x1d   :  { %v36_v17 = vshrl.u32 %v35_v16, 5  ;;  %v37_v18 = vand.u32 31, %v35_v16  ;;  %v140_v21 = vand.u32 31, %v138_v19  ;;  %v374_v34 = vshrl.u32 %v138_v19, 5  ;;  %p310_p12 = pnand %p309_p11, %p303_p8 }
  0x1f   :  { %v38_v23 = vsub.s32 32, %v37_v18  ;;  %v40_v25 = vshll.u32 %v329_v24, %v37_v18  ;;  %v43_v27 = vshll.u32 %v330_v26, %v37_v18  ;;  %v46_v29 = vshll.u32 %v331_v28, %v37_v18 }
  0x20   :  { %v49_v31 = vshll.u32 %v332_v30, %v37_v18  ;;  %v52_v33 = vshll.u32 %v333_v32, %v37_v18  ;;  %vm55_vm2 = vcmp.lt.s32.totalorder %v36_v17, 1  ;;  %vm56_vm3 = vcmp.lt.s32.totalorder %v36_v17, 2 }
  0x21   :  { %v39_v35 = vshrl.u32 %v329_v24, %v38_v23  ;;  %v41_v36 = vshrl.u32 %v330_v26, %v38_v23  ;;  %v44_v37 = vshrl.u32 %v331_v28, %v38_v23  ;;  %v47_v38 = vshrl.u32 %v332_v30, %v38_v23 }
  0x22   :  { %v50_v39 = vshrl.u32 %v333_v32, %v38_v23  ;;  %v53_v41 = vshrl.u32 %v334_v40, %v38_v23  ;;  %vm58_vm4 = vcmp.lt.s32.totalorder %v36_v17, 4  ;;  %v141_v45 = vsub.s32 32, %v140_v21 }
  0x23   :  { %v42_v42 = vor.u32 %v41_v36, %v40_v25  ;;  %v45_v43 = vor.u32 %v44_v37, %v43_v27  ;;  %v48_v44 = vor.u32 %v47_v38, %v46_v29  ;;  %vm57_vm5 = vcmp.lt.s32.totalorder %v36_v17, 3 }
  0x24   :  { %v51_v46 = vor.u32 %v50_v39, %v49_v31  ;;  %v54_v47 = vor.u32 %v53_v41, %v52_v33  ;;  %v143_v48 = vshll.u32 %v329_v24, %v140_v21  ;;  %v146_v56 = vshll.u32 %v330_v26, %v140_v21 }
  0x25   :  { %v59_v49 = vsel %vm55_vm2, %v39_v35, %v42_v42  ;;  %v60_v50 = vsel %vm58_vm4, %v48_v44, 2102212464  ;;  %v63_v51 = vsel %vm55_vm2, %v42_v42, %v45_v43  ;;  %v67_v52 = vsel %vm55_vm2, %v45_v43, %v48_v44 }
  0x26   :  { %v61_v53 = vsel %vm57_vm5, %v45_v43, %v60_v50  ;;  %v64_v54 = vsel %vm58_vm4, %v51_v46, 920167782  ;;  %v68_v55 = vsel %vm58_vm4, %v54_v47, 1326507024  ;;  %v142_v59 = vshrl.u32 %v329_v24, %v141_v45 }
  0x27   :  { %v65_v57 = vsel %vm57_vm5, %v48_v44, %v64_v54  ;;  %v69_v58 = vsel %vm57_vm5, %v51_v46, %v68_v55  ;;  %v144_v60 = vshrl.u32 %v330_v26, %v141_v45  ;;  %v62_v61 = vsel %vm56_vm3, %v59_v49, %v61_v53 }
  0x28   :  { %v66_v62 = vsel %vm56_vm3, %v63_v51, %v65_v57  ;;  %v70_v63 = vsel %vm56_vm3, %v67_v52, %v69_v58  ;;  %v147_v3 = vshrl.u32 %v331_v28, %v141_v45  ;;  %v149_v11 = vshll.u32 %v331_v28, %v140_v21 }
  0x29   :  { %v383_v5 = vmul.u32.u64.low %v370_v20, %v70_v63  ;;  %v384_v6 = vmul.u32.u64.high %v370_v20, %v70_v63, %v383_v5  ;;  %v387_v7 = vmul.u32.u64.low %v370_v20, %v66_v62  ;;  %v388_v8 = vmul.u32.u64.high %v370_v20, %v66_v62, %v387_v7 }
  0x2a   :  { %v145_v9 = vor.u32 %v144_v60, %v143_v48  ;;  %v148_v10 = vor.u32 %v147_v3, %v146_v56  ;;  %v150_v12 = vshrl.u32 %v332_v30, %v141_v45  ;;  %v152_v13 = vshll.u32 %v332_v30, %v140_v21 }
  0x2b   :  { %v153_v14 = vshrl.u32 %v333_v32, %v141_v45  ;;  %v155_v15 = vshll.u32 %v333_v32, %v140_v21  ;;  %v156_v16 = vshrl.u32 %v334_v40, %v141_v45  ;;  %v78_v17 = vmul.u32 %v370_v20, %v62_v61 }
  0x2c   :  { %v151_v18 = vor.u32 %v150_v12, %v149_v11  ;;  %vm158_vm6 = vcmp.lt.s32.totalorder %v374_v34, 1  ;;  %vm159_vm7 = vcmp.lt.s32.totalorder %v374_v34, 2  ;;  %vm80_vm8 = vc.u32 %v384_v6, %v387_v7 }
  0x2d   :  { %v81_v19 = vadd.s32 1, %v388_v8  ;;  %v154_v23 = vor.u32 %v153_v14, %v152_v13  ;;  %vm160_vm9 = vcmp.lt.s32.totalorder %v374_v34, 3  ;;  %v157_v24 = vor.u32 %v156_v16, %v155_v15 }
  0x2e   :  { %vm161_vm10 = vcmp.lt.s32.totalorder %v374_v34, 4  ;;  %v162_v25 = vsel %vm158_vm6, %v142_v59, %v145_v9  ;;  %v166_v21 = vsel %vm158_vm6, %v145_v9, %v148_v10  ;;  %v170_v28 = vsel %vm158_vm6, %v148_v10, %v151_v18 }
  0x2f   :  { %v82_v26 = vsel %vm80_vm8, %v81_v19, %v388_v8  ;;  %v163_v20 = vsel %vm161_vm10, %v151_v18, 2102212464  ;;  %v167_v27 = vsel %vm161_vm10, %v154_v23, 920167782  ;;  %v171_v32 = vsel %vm161_vm10, %v157_v24, 1326507024 }
  0x30   :  { %v83_v29 = vadd.s32 %v82_v26, %v78_v17  ;;  %v164_v30 = vsel %vm160_vm9, %v148_v10, %v163_v20  ;;  %v168_v31 = vsel %vm160_vm9, %v151_v18, %v167_v27  ;;  %v172_v36 = vsel %vm160_vm9, %v154_v23, %v171_v32 }
  0x31   :  { %v165_v33 = vsel %vm159_vm7, %v162_v25, %v164_v30  ;;  %v169_v35 = vsel %vm159_vm7, %v166_v21, %v168_v31  ;;  %v173_v38 = vsel %vm159_vm7, %v170_v28, %v172_v36  ;;  %v79_v57 = vadd.s32 %v387_v7, %v384_v6 }
  0x32   :  { %v84_v37 = vadd.s32 536870912, %v83_v29  ;;  %v405_v39 = vmul.u32.u64.low %v372_v22, %v169_v35  ;;  %v406_v40 = vmul.u32.u64.high %v372_v22, %v169_v35, %v405_v39  ;;  %v181_v44 = vmul.u32 %v372_v22, %v165_v33 }
  0x33   :  { %v409_v41 = vmul.u32.u64.low %v372_v22, %v173_v38  ;;  %v410_v42 = vmul.u32.u64.high %v372_v22, %v173_v38, %v409_v41  ;;  %vm115_vm5 = vweird.f32 %v358_v0  ;;  %vm218_vm9 = vweird.f32 %v360_v1 }
  0x34   :  { %v85_v43 = vshrl.u32 %v84_v37, 30  ;;  %v184_v46 = vadd.s32 1, %v406_v40 }
  0x35   :  { %vm183_vm11 = vc.u32 %v410_v42, %v405_v39  ;;  %v182_v13 = vadd.s32 %v405_v39, %v410_v42 }
  0x36   :  { %v86_v45 = vshll.u32 %v85_v43, 30  ;;  %v185_v34 = vsel %vm183_vm11, %v184_v46, %v406_v40  ;;  %v109_v25 = vsub.s32 4, %v85_v43 }
  0x37   :  { %v186_v48 = vadd.s32 %v185_v34, %v181_v44 }
  0x38   :  { %v87_v47 = vsub.s32 %v83_v29, %v86_v45  ;;  %v110_v30 = vsel %vm25_vm14, %v109_v25, %v85_v43 }
  0x39   :  { %v187_v50 = vadd.s32 536870912, %v186_v48  ;;  %v112_v2 = vsel %vm421_vm15, 0, %v110_v30 }
  0x3a   :  { %v89_v49 = vsub.s32 0, %v87_v47  ;;  %v116_v37 = vand.u32 3, %v112_v2 }
  0x3b   :  { %v188_v52 = vshrl.u32 %v187_v50, 30 }
  0x3c   :  { %v249_v51 = vmin.u32 %v89_v49, %v87_v47  ;;  %vm121_vm2 = vcmp.eq.s32.totalorder %v116_v37, 2  ;;  %vm118_vm3 = vcmp.eq.s32.totalorder %v116_v37, 0  ;;  %vm117_vm4 = vcmp.lt.s32.totalorder %v116_v37, 2 }
  0x3d   :  { %v189_v54 = vshll.u32 %v188_v52, 30  ;;  %v212_v36 = vsub.s32 4, %v188_v52 }
  0x3e   :  { %v91_v53 = vclz %v249_v51 }
  0x3f   :  { %v190_v56 = vsub.s32 %v186_v48, %v189_v54  ;;  %v213_v40 = vsel %vm128_vm0, %v212_v36, %v188_v52 }
  0x40   :  { %v250_v55 = vadd.s32 4294967294, %v91_v53  ;;  %v215_v44 = vsel %vm433_vm1, 0, %v213_v40 }
  0x41   :  { %v192_v58 = vsub.s32 0, %v190_v56  ;;  %v219_v34 = vand.u32 3, %v215_v44 }
  0x42   :  { %vm251_vm12 = vcmp.lt.s32.totalorder %v250_v55, 0 }
  0x43   :  { %v94_v22 = vsel %vm251_vm12, 0, %v250_v55  ;;  %v253_v62 = vmin.u32 %v192_v58, %v190_v56  ;;  %vm224_vm6 = vcmp.eq.s32.totalorder %v219_v34, 2  ;;  %vm221_vm7 = vcmp.eq.s32.totalorder %v219_v34, 0 }
  0x44   :  { %v95_v59 = vsub.s32 32, %v94_v22  ;;  %v96_v60 = vshll.u32 %v87_v47, %v94_v22  ;;  %v99_v61 = vsub.s32 4294967266, %v94_v22  ;;  %vm220_vm8 = vcmp.lt.s32.totalorder %v219_v34, 2 }
  0x45   :  { %v194_v5 = vclz %v253_v62 }
  0x46   :  { %v97_v63 = vshrl.u32 %v79_v57, %v95_v59  ;;  %v100_v3 = vadd.s32 127, %v99_v61 }
  0x47   :  { %v254_v10 = vadd.s32 4294967294, %v194_v5 }
  0x48   :  { %v98_v8 = vor.u32 %v97_v63, %v96_v60  ;;  %v101_v9 = vshll.u32 %v100_v3, 23 }
  0x49   :  { %vm255_vm13 = vcmp.lt.s32.totalorder %v254_v10, 0 }
  0x4a   :  { %v102_v11 = vor.u32 4788187, %v101_v9  ;;  %v105_v12 = vcvt.s32.f32 %v98_v8  ;;  %v197_v6 = vsel %vm255_vm13, 0, %v254_v10 }
  0x4b   :  { %v198_v7 = vsub.s32 32, %v197_v6  ;;  %v199_v15 = vshll.u32 %v190_v56, %v197_v6  ;;  %v202_v16 = vsub.s32 4294967266, %v197_v6 }
  0x4c   :  { %v103_v14 = vand.u32 2147483647, %v102_v11 }
  0x4d   :  { %v200_v18 = vshrl.u32 %v182_v13, %v198_v7  ;;  %v203_v19 = vadd.s32 127, %v202_v16 }
  0x4e   :  { %v106_v17 = vmul.f32 %v105_v12, %v103_v14 }
  0x4f   :  { %v201_v21 = vor.u32 %v200_v18, %v199_v15  ;;  %v204_v26 = vshll.u32 %v203_v19, 23 }
  0x50   :  { %v107_v24 = vxor.u32 2147483648, %v106_v17 }
  0x51   :  { %v205_v28 = vor.u32 4788187, %v204_v26  ;;  %v208_v29 = vcvt.s32.f32 %v201_v21 }
  0x52   :  { %v108_v20 = vsel %vm25_vm14, %v107_v24, %v106_v17 }
  0x53   :  { %v111_v27 = vsel %vm421_vm15, %v358_v0, %v108_v20  ;;  %v206_v31 = vand.u32 2147483647, %v205_v28 }
  0x54   :  { %272 = vcosq.f32 %v111_v27 }
  0x55   :  { %274 = vsinq.f32 %v111_v27  ;;  %v209_v32 = vmul.f32 %v208_v29, %v206_v31 }
  0x57   :  { %v210_v35 = vxor.u32 2147483648, %v209_v32 }
  0x59   :  { %v211_v38 = vsel %vm128_vm0, %v210_v35, %v209_v32 }
  0x5a   :  { %v214_v39 = vsel %vm433_vm1, %v360_v1, %v211_v38 }
  0x5b   :  { %276 = vcosq.f32 %v214_v39 }
  0x5c   :  { %278 = vsinq.f32 %v214_v39 }
  0x5e   :  { %v273_v41 = vpop.eup %272 }
  0x5f   :  { %v275_v42 = vpop.eup %274  ;;  %v122_v43 = vxor.u32 2147483648, %v273_v41 }
  0x60   :  { %v119_v4 = vxor.u32 2147483648, %v275_v42 }
  0x61   :  { %v123_v45 = vsel %vm121_vm2, %v122_v43, %v275_v42 }
  0x62   :  { %v120_v46 = vsel %vm118_vm3, %v273_v41, %v119_v4 }
  0x63   :  { %v124_v47 = vsel %vm117_vm4, %v120_v46, %v123_v45 }
  0x64   :  { %v125_v48 = vsel %vm115_vm5, nan, %v124_v47 }
  0x65   :  { %v229_v49 = vmul.f32 %v125_v48, %v358_v0  ;;  %v277_v50 = vpop.eup %276 }
  0x66   :  { %v279_v51 = vpop.eup %278  ;;  %v225_v52 = vxor.u32 2147483648, %v277_v50 }
  0x67   :  { %231 = vst [vmem:[#allocation5] sm:$0xff] %v229_v49  ;;  %v222_v53 = vxor.u32 2147483648, %v279_v51 }
  0x68   :  { %v226_v54 = vsel %vm224_vm6, %v225_v52, %v279_v51 }
  0x69   :  { %v223_v55 = vsel %vm221_vm7, %v277_v50, %v222_v53 }
  0x6a   :  { %v227_v56 = vsel %vm220_vm8, %v223_v55, %v226_v54 }
  0x6b   :  { %v228_v57 = vsel %vm218_vm9, nan, %v227_v56 }
  0x6c   :  { %v230_v22 = vmul.f32 %v228_v57, %v360_v1 }
  0x6e   :  { %232 = vst [vmem:[#allocation5 + $0x8] sm:$0xff] %v230_v22 }
  0x6f   :  { %313 = shalt.err (!%p310_p12)
}
  0x70   :  { %s314_s22 = scalar_lea.hbm %s459_s1, 256 }
  0x71   :  { %p315_p13 = scmp.ne.s32.totalorder %s459_s1, %s314_s22  ;;  %p318_p0 = scmp.lt.u32.totalorder %s314_s22, %s459_s1 }
  0x73   :  { %p320_p1 = pnand %p318_p0, %p315_p13 }
  0x75   :  { %323 = shalt.err (!%p320_p1)
}
  0x76   :  { %242 = dma.vmem_to_hbm [thread:$0]  %s240_s18, 256, %s459_s1, [#allocation4]  }
  0x77   :  { %326 = dma.done.wait [#allocation4], 256  }
  0x78   :  { %327 = vsyncadd [#allocation4], 4294967040 }
  0x79   :  { %246 = vsyncpa [#allocation3], 1 }
  0x7a   :  { %247 = vsyncpa [#allocation4], 1 }

</bundles_post_ra>
